<compile_context>
chip_gen: v5e
topology: v5e:2x2
jax: 0.10.0
libtpu: 0.0.40
codegen_flags: <defaults>
</compile_context>

<pallas_src>
import jax
import jax.numpy as jnp
from jax.experimental import pallas as pl
from jax.experimental.pallas import tpu as pltpu


def _value_gemv_kernel(x_ref, w_ref, b_ref, o_ref):
    # x_ref: [TB, D] VMEM tile   w_ref: [1, D] VMEM (resident)   b_ref: [1, 1] SMEM
    x = x_ref[...]
    w = w_ref[...]                                  # broadcasts over the TB rows
    # N == 1 contraction: VPU multiply + XLU lane reduce (MXU stays idle).
    s = jnp.sum(x * w, axis=-1, keepdims=True)      # [TB, 1]
    o_ref[...] = (s + b_ref[0, 0]).astype(o_ref.dtype)


def fold_value_params(w1, b1, w2, b2):
    """Collapse the two affine layers (no activation) into a single GEMV.

    Do this once at param init / update time; it is mathematically identical
    to output_layer(input_layer(x)).
    """
    w_eff = (w1 @ w2).reshape(1, -1)       # [1, D] row layout for VPU broadcast
    b_eff = (b1 @ w2 + b2).reshape(1, 1)   # [1, 1]
    return w_eff, b_eff


def _value_gemv(x, w_eff, b_eff, *, max_tile=512):
    B, D = x.shape
    # Batch tile: keep the sublane dim a multiple of 8; 512-row f32 tiles,
    # double-buffered, are tiny even under v7x's 32 MiB scoped VMEM default.
    TB = min(max_tile, pl.cdiv(B, 8) * 8)
    B_pad = pl.cdiv(B, TB) * TB
    if B_pad != B:
        x = jnp.pad(x, ((0, B_pad - B), (0, 0)))
    num_tiles = B_pad // TB

    out = pl.pallas_call(
        _value_gemv_kernel,
        out_shape=jax.ShapeDtypeStruct((B_pad, 1), jnp.float32),
        grid=(num_tiles,),
        in_specs=[
            pl.BlockSpec((TB, D), lambda i: (i, 0)),            # x batch tile
            pl.BlockSpec((1, D), lambda i: (0, 0)),             # folded weights, resident
            pl.BlockSpec((1, 1), lambda i: (0, 0),
                         memory_space=pltpu.MemorySpace.SMEM),  # folded bias scalar
        ],
        out_specs=pl.BlockSpec((TB, 1), lambda i: (i, 0)),
        compiler_params=pltpu.CompilerParams(
            dimension_semantics=("parallel",)),
        cost_estimate=pl.CostEstimate(
            flops=2 * B_pad * D,
            transcendentals=0,
            bytes_accessed=B_pad * D * 4 + D * 4 + 4 + B_pad * 4),
    )(x, w_eff, b_eff)
    # TODO(synk): for very large production batches, a lane-dense (1, TB)
    # output layout (batch on lanes) would avoid masked vst.msk column stores.
    return out[:B]


def value_network_forward(state, w1, b1, w2, b2):
    """state: [B, D] float32. Returns [B, 1] float32 (same math as the module)."""
    B, D = state.shape
    H = w1.shape[1]
    assert w1.shape == (D, H) and b1.shape == (1, H)
    assert w2.shape == (H, 1) and b2.shape == (1, 1)
    w_eff, b_eff = fold_value_params(w1, b1, w2, b2)
    return _value_gemv(state, w_eff, b_eff)


def init_value_network_params(observation_shape, key):
    """Deterministic init mirroring torch.nn.Linear's U(-1/sqrt(fan_in), 1/sqrt(fan_in))."""
    D = observation_shape
    H = 2 * D
    k1, k2, k3, k4 = jax.random.split(key, 4)
    bound1 = 1.0 / jnp.sqrt(jnp.float32(D))
    bound2 = 1.0 / jnp.sqrt(jnp.float32(H))
    # stored as [in, out] so the math is x @ W + b
    w1 = jax.random.uniform(k1, (D, H), jnp.float32, -bound1, bound1)
    b1 = jax.random.uniform(k2, (1, H), jnp.float32, -bound1, bound1)
    w2 = jax.random.uniform(k3, (H, 1), jnp.float32, -bound2, bound2)
    b2 = jax.random.uniform(k4, (1, 1), jnp.float32, -bound2, bound2)
    return w1, b1, w2, b2


if __name__ == "__main__":
    observation_shape = 16   # D
    batch = 8                # B

    key = jax.random.PRNGKey(0)
    pkey, xkey = jax.random.split(key)

    w1, b1, w2, b2 = init_value_network_params(observation_shape, pkey)
    state = jax.random.normal(xkey, (batch, observation_shape), jnp.float32)

    out = value_network_forward(state, w1, b1, w2, b2)
    out = jax.block_until_ready(out)

    # correctness check against the un-folded two-layer reference math
    ref = (state @ w1 + b1) @ w2 + b2
    assert out.shape == (batch, 1)
    assert jnp.allclose(out, ref, atol=1e-5, rtol=1e-4)

    print("KERNEL_OK")
</pallas_src>

<mosaic_0001>
module attributes {stable_mosaic.version = 11 : i64} {
  func.func @_value_gemv_kernel(%arg0: i32, %arg1: memref<8x16xf32, #tpu.memory_space<vmem>>, %arg2: memref<1x16xf32, #tpu.memory_space<vmem>>, %arg3: memref<1x1xf32, #tpu.memory_space<smem>>, %arg4: memref<8x1xf32, #tpu.memory_space<vmem>>) attributes {dimension_semantics = [#tpu.dimension_semantics<parallel>], iteration_bounds = array<i64: 1>, scalar_prefetch = 0 : i64, scratch_operands = 0 : i64, tpu.core_type = #tpu.core_type<tc>, window_params = [{transform_indices = @transform_0, window_bounds = array<i64: 8, 16>}, {pipeline_mode = #tpu.pipeline_mode<synchronous>, transform_indices = @transform_1, window_bounds = array<i64: 1, 16>}, {transform_indices = @transform_2, window_bounds = array<i64: 1, 1>}, {transform_indices = @transform_3, window_bounds = array<i64: 8, 1>}]} {
    %c0 = arith.constant 0 : index
    %c0_0 = arith.constant 0 : index
    %0 = vector.load %arg1[%c0, %c0_0] : memref<8x16xf32, #tpu.memory_space<vmem>>, vector<8x16xf32>
    %c0_1 = arith.constant 0 : index
    %c0_2 = arith.constant 0 : index
    %1 = vector.load %arg2[%c0_1, %c0_2] : memref<1x16xf32, #tpu.memory_space<vmem>>, vector<1x16xf32>
    %2 = vector.broadcast %1 : vector<1x16xf32> to vector<8x16xf32>
    %3 = arith.mulf %0, %2 : vector<8x16xf32>
    %cst = arith.constant dense<0.000000e+00> : vector<8xf32>
    %4 = vector.multi_reduction <add>, %3, %cst [1] : vector<8x16xf32> to vector<8xf32>
    %5 = vector.shape_cast %4 : vector<8xf32> to vector<8x1xf32>
    %c0_3 = arith.constant 0 : index
    %c0_4 = arith.constant 0 : index
    %6 = memref.load %arg3[%c0_3, %c0_4] : memref<1x1xf32, #tpu.memory_space<smem>>
    %7 = vector.broadcast %6 : f32 to vector<8x1xf32>
    %8 = arith.addf %5, %7 : vector<8x1xf32>
    %c0_5 = arith.constant 0 : index
    %c0_6 = arith.constant 0 : index
    %9 = vector.load %arg4[%c0_5, %c0_6] : memref<8x1xf32, #tpu.memory_space<vmem>>, vector<8x1xf32>
    tpu.vector_store %arg4[%c0_5, %c0_6], %8 {strides = array<i32>} : memref<8x1xf32, #tpu.memory_space<vmem>>, vector<8x1xf32>,
    return
  }
  func.func @transform_0(%arg0: i32) -> (i32, i32) {
    %c0_i32 = arith.constant 0 : i32
    %c0_i32_0 = arith.constant 0 : i32
    return %arg0, %c0_i32 : i32, i32
  }
  func.func @transform_1(%arg0: i32) -> (i32, i32) {
    %c0_i32 = arith.constant 0 : i32
    %c0_i32_0 = arith.constant 0 : i32
    %c0_i32_1 = arith.constant 0 : i32
    return %c0_i32, %c0_i32_0 : i32, i32
  }
  func.func @transform_2(%arg0: i32) -> (i32, i32) {
    %c0_i32 = arith.constant 0 : i32
    %c0_i32_0 = arith.constant 0 : i32
    %c0_i32_1 = arith.constant 0 : i32
    return %c0_i32, %c0_i32_0 : i32, i32
  }
  func.func @transform_3(%arg0: i32) -> (i32, i32) {
    %c0_i32 = arith.constant 0 : i32
    %c0_i32_0 = arith.constant 0 : i32
    return %arg0, %c0_i32 : i32, i32
  }
}

</mosaic_0001>

<bundles_post_ra>
// kernel: tpu_custom_call.1
= control target key start
LH: loop header
LB: loop body
LE: loop exit
PB: predicated region body
PF: predicated region fallthrough
CT: control target
= control target key end

     0   :  { %9 = vsyncpa [#allocation4], 0  ;;  %s77_s15 = smov [#allocation3]   ;;  %s110_s0 = inlined_call_operand.hbm [shape: f32[8,16], index: 0, kind: input, shape index: {}]   ;;  %s111_s1 = inlined_call_operand.vmem [shape: f32[1,16], index: 1, kind: input, shape index: {}]   ;;  %s112_s2 = inlined_call_operand.<no memory space> [shape: f32[1,1], index: 2, kind: input, shape index: {}]   ;;  %s113_s3 = inlined_call_operand.vmem [shape: f32[8,1], index: 3, kind: output, shape index: {}]  }
   0x1   :  { %s15_s14 = sshll.u32 %s110_s0, 4  ;;  %s17_s16 = sshll.u32 %s77_s15, 4  ;;  %s16_s14 = int_to_ptr.hbm [resolvable:$true] %s15_s14  ;;  %s18_s16 = int_to_ptr.vmem [resolvable:$true] %s17_s16 }
   0x2   :  { %20 = dma.hbm_to_vmem [thread:$0]  %s16_s14, 128, %s18_s16, [#allocation4]  }
   0x3   :  { %75 = dma.done.wait [#allocation4], 128  }
   0x4   :  { %76 = vsyncadd [#allocation4], 4294967168  ;;  %v29_v0 = vld [vmem:[#allocation3] sm:$0xff]  ;;  %vm35_vm0 = vcmask 130048   ;;  %v40_v4 = vstv %s112_s2  ;;  %vm42_vm1 = vcmask 7168  }
   0x5   :  { %v50_v1 = vld [vmem:[%s111_s1] ss:$0 sm:$0xff] }
   0x6   :  { %v34_v2 = vmul.f32 %v50_v1, %v29_v0 }
   0x8   :  { %v36_v3 = vsel %vm35_vm0, %v34_v2, 0.0 }
   0x9   :  { %37 = vadd.xlane.f32.xlu0 %v36_v3 }
  0x7c   :  { %v38_v5 = vpop.xlane.xlu0 %37 }
  0x7d   :  { %v41_v6 = vadd.f32 %v40_v4, %v38_v5 }
  0x7f   :  { %43 = vst.msk [vmem:[%s113_s3] sm:$0xff] %vm42_vm1, %v41_v6 }
  0x80   :  { %48 = vsyncpa [#allocation4], 1 }

</bundles_post_ra>
